<compile_context>
chip_gen: v7x
topology: tpu7x:2x2x1
jax: 0.10.0
libtpu: 0.0.40
codegen_flags: <defaults>
</compile_context>

<pallas_src>
import functools
import math

import jax
import jax.numpy as jnp
from jax.experimental import pallas as pl
from jax.experimental.pallas import tpu as pltpu

_LOG_EPS = math.log(1e-7)   # clamp for log(sigmoid); tracks log(p + 1e-7)
_PAD_LOGIT = -1.0e4         # sigmoid(-1e4) == 0 and softplus(-1e4) == 0 -> zero contribution


def _round_up(n, m):
    return ((n + m - 1) // m) * m


def _largest_tile(extent, align, cap):
    """Largest multiple of `align` that divides `extent` and is <= cap (or extent itself)."""
    if extent <= cap:
        return extent
    best = align
    d = align
    while d <= cap:
        if extent % d == 0:
            best = d
        d += align
    return best


def _int_pow(base, exponent):
    # gamma is typically an integer (2.0) -> repeated multiply (VPU only, no EUP).
    if float(exponent).is_integer() and float(exponent) >= 0:
        g = int(exponent)
        if g == 0:
            return jnp.ones_like(base)
        out = base
        for _ in range(g - 1):
            out = out * base
        return out
    return jnp.power(base, exponent)


def _fold_lanes(a):
    """(TR, TL) -> (TR, 128): add the TL/128 lane chunks with plain VALU adds (no XLU)."""
    tl = a.shape[-1]
    acc = a[:, 0:128]
    for c in range(1, tl // 128):
        acc = acc + a[:, c * 128:(c + 1) * 128]
    return acc


def _loss_kernel(x_ref, y_ref, ef_ref, inter_ref, union_ref, *,
                 gamma, bce_w, a_pos, a_neg, use_approx_recip):
    # NOTE: grid ids are only read at the top level (never inside pl.when bodies).
    h = pl.program_id(2)        # reduction step along the H*W axis

    @pl.when(h == 0)
    def _init():
        ef_ref[...] = jnp.zeros_like(ef_ref)
        inter_ref[...] = jnp.zeros_like(inter_ref)
        union_ref[...] = jnp.zeros_like(union_ref)

    x = x_ref[...].astype(jnp.float32)      # (TR, TL)
    y = y_ref[...].astype(jnp.float32)      # (TR, TL)

    # Shared transcendentals: one exp, one log1p (and one EUP reciprocal) per element.
    ax = jnp.abs(x)
    e = jnp.exp(-ax)                        # exp(-|x|)
    sp = jnp.log1p(e)                       # softplus(-|x|) = log(1 + exp(-|x|))
    relu_x = jnp.maximum(x, 0.0)

    # Numerically stable BCE-with-logits (== nn.BCEWithLogitsLoss elementwise).
    bce = relu_x - x * y + sp
    if bce_w != 1.0:
        bce = bce_w * bce

    # sigmoid / (1 - sigmoid) from the shared exp, via one reciprocal.
    denom = 1.0 + e
    if use_approx_recip:
        r0 = pl.reciprocal(denom, approx=True)
        inv = r0 * (2.0 - denom * r0)       # one Newton step -> ~1e-7 relative error
    else:
        inv = 1.0 / denom
    t = e * inv
    nonneg = x >= 0.0
    p = jnp.where(nonneg, inv, t)           # sigmoid(x)
    one_m_p = jnp.where(nonneg, t, inv)     # 1 - sigmoid(x), no cancellation

    # log(sigmoid) / log(1 - sigmoid) clamped at log(1e-7): tracks the reference's
    # log(p + 1e-7) to ~1e-6 for non-saturated logits and stays bounded when saturated.
    # TODO(synk): exact log(p + 1e-7) for heavily saturated positive-target logits would
    # need an extra jnp.log per element (EUP); left approximate on purpose.
    log_p = jnp.maximum(jnp.minimum(x, 0.0) - sp, _LOG_EPS)
    log_1mp = jnp.maximum(-relu_x - sp, _LOG_EPS)

    focal = (-a_pos) * _int_pow(one_m_p, gamma) * y * log_p \
        - a_neg * _int_pow(p, gamma) * (1.0 - y) * log_1mp

    ef = bce + focal                         # weighted bce + weighted focal, per element

    # Lane-dense accumulation directly into the VMEM-resident output blocks.
    ef_ref[...] += _fold_lanes(ef)
    inter_ref[...] += _fold_lanes(p * y)
    union_ref[...] += _fold_lanes(p + y)


def dice_focal_bce_loss(logits, targets, alpha=0.8, gamma=2.0,
                        bce_weight=1.0, dice_weight=1.0, focal_weight=1.0,
                        block_bytes=None):
    assert logits.shape == targets.shape and logits.ndim == 4
    N, C, H, W = logits.shape
    NC, HW = N * C, H * W

    x2 = logits.reshape(NC, HW)
    y2 = targets.reshape(NC, HW)

    # ---- generation-aware budgets -------------------------------------------------
    try:
        vmem_bytes = int(pltpu.get_tpu_info().vmem_capacity_bytes)
    except Exception:
        vmem_bytes = 64 * 1024 * 1024            # conservative: v7x per-core VMEM
    if block_bytes is None:
        block_bytes = 8 * 2**20 if vmem_bytes >= 128 * 2**20 else 4 * 2**20
    vmem_limit = int(min(vmem_bytes // 2, 64 * 2**20))

    # ---- padding with neutral sentinels (exactly zero contribution) ---------------
    row_align = max(8, 32 // min(x2.dtype.itemsize, y2.dtype.itemsize))
    NC_pad = _round_up(NC, row_align)
    HW_pad = _round_up(HW, 128)
    if NC_pad != NC or HW_pad != HW:
        pad = ((0, NC_pad - NC), (0, HW_pad - HW))
        x2 = jnp.pad(x2, pad, constant_values=_PAD_LOGIT)   # sigmoid==0, bce==0, focal==0
        y2 = jnp.pad(y2, pad, constant_values=0)

    # ---- tiling: rows first (keep >=2 "parallel" row blocks when possible) --------
    tr_byte_cap = max(row_align, (block_bytes // (128 * 4)) // row_align * row_align)
    if NC_pad >= 2 * row_align:
        tr_cap = min(tr_byte_cap, max(row_align, (NC_pad // 2) // row_align * row_align))
    else:
        tr_cap = min(tr_byte_cap, NC_pad)
    TR = _largest_tile(NC_pad, row_align, tr_cap)
    GR = NC_pad // TR

    # Lanes: as wide as the byte budget allows (fewer steps, better HBM pipelining).
    tl_cap = max(128, (block_bytes // (TR * 4)) // 128 * 128)
    if GR == 1 and HW_pad >= 256:
        # Ensure >=2 lane blocks so the reduction can be split across both TensorCores.
        tl_cap = min(tl_cap, max(128, (HW_pad // 2) // 128 * 128))
    TL = _largest_tile(HW_pad, 128, tl_cap)
    GH_total = HW_pad // TL
    if GR == 1 and GH_total > 1 and GH_total % 2 == 1 and TL % 256 == 0:
        TL //= 2
        GH_total *= 2
    GS = 2 if (GR == 1 and GH_total >= 2 and GH_total % 2 == 0) else 1
    GH = GH_total // GS

    kernel = functools.partial(
        _loss_kernel,
        gamma=float(gamma),
        bce_w=float(bce_weight),
        a_pos=float(alpha) * float(focal_weight),
        a_neg=(1.0 - float(alpha)) * float(focal_weight),
        use_approx_recip=(jax.default_backend() == "tpu" and hasattr(pl, "reciprocal")),
    )

    in_spec = pl.BlockSpec((TR, TL), lambda r, s, h: (r, s * GH + h))
    out_spec = pl.BlockSpec((None, TR, 128), lambda r, s, h: (s, r, 0))
    out_sds = jax.ShapeDtypeStruct((GS, NC_pad, 128), jnp.float32)

    ef_out, inter_out, union_out = pl.pallas_call(
        kernel,
        out_shape=(out_sds, out_sds, out_sds),
        grid_spec=pltpu.PrefetchScalarGridSpec(
            num_scalar_prefetch=0,
            grid=(GR, GS, GH),
            in_specs=[in_spec, in_spec],
            out_specs=(out_spec, out_spec, out_spec),
        ),
        compiler_params=pltpu.CompilerParams(
            dimension_semantics=("parallel", "parallel", "arbitrary"),
            vmem_limit_bytes=vmem_limit),
    )(x2, y2)

    # Tiny final combine in XLA: 128-lane reduce, dice nonlinearity, weighting.
    ef_total = jnp.sum(ef_out)                         # padded elements contribute exactly 0
    inter = jnp.sum(inter_out, axis=(0, 2))[:NC]       # (NC,)
    union = jnp.sum(union_out, axis=(0, 2))[:NC]       # (NC,)
    dice = jnp.mean(1.0 - (2.0 * inter + 1e-7) / (union + 1e-7))
    return ef_total / float(NC * HW) + float(dice_weight) * dice


def _reference(logits, targets, alpha=0.8, gamma=2.0,
               bce_weight=1.0, dice_weight=1.0, focal_weight=1.0):
    x = logits.astype(jnp.float32)
    y = targets.astype(jnp.float32)
    bce = jnp.mean(jnp.maximum(x, 0.0) - x * y + jnp.log1p(jnp.exp(-jnp.abs(x))))
    p = jax.nn.sigmoid(x)
    focal = -alpha * (1.0 - p) ** gamma * y * jnp.log(p + 1e-7)
    focal = focal - (1.0 - alpha) * p ** gamma * (1.0 - y) * jnp.log(1.0 - p + 1e-7)
    focal = jnp.mean(focal)
    inter = jnp.sum(p * y, axis=(2, 3))
    union = jnp.sum(p, axis=(2, 3)) + jnp.sum(y, axis=(2, 3))
    dice = jnp.mean(1.0 - (2.0 * inter + 1e-7) / (union + 1e-7))
    return bce_weight * bce + focal_weight * focal + dice_weight * dice


if __name__ == "__main__":
    key = jax.random.PRNGKey(0)
    k_logits, k_targets = jax.random.split(key)

    N, C, H, W = 2, 4, 16, 16
    logits = jax.random.normal(k_logits, (N, C, H, W), dtype=jnp.float32)
    # Hard {0, 1} masks: bf16 is lossless and halves the targets' HBM reads.
    targets = jax.random.bernoulli(
        k_targets, p=0.5, shape=(N, C, H, W)).astype(jnp.bfloat16)

    loss = jax.block_until_ready(dice_focal_bce_loss(logits, targets))
    ref = jax.block_until_ready(_reference(logits, targets))
    assert jnp.allclose(loss, ref, rtol=2e-5, atol=2e-5), (loss, ref)

    print("KERNEL_OK")
</pallas_src>

<mosaic_0001>
module attributes {stable_mosaic.version = 11 : i64} {
  func.func @_loss_kernel(%arg0: i32, %arg1: i32, %arg2: i32, %arg3: memref<16x128xf32, #tpu.memory_space<vmem>>, %arg4: memref<16x128xbf16, #tpu.memory_space<vmem>>, %arg5: memref<1x16x128xf32, #tpu.memory_space<vmem>>, %arg6: memref<1x16x128xf32, #tpu.memory_space<vmem>>, %arg7: memref<1x16x128xf32, #tpu.memory_space<vmem>>) attributes {dimension_semantics = [#tpu.dimension_semantics<parallel>, #tpu.dimension_semantics<parallel>, #tpu.dimension_semantics<arbitrary>], iteration_bounds = array<i64: 1, 2, 1>, scalar_prefetch = 0 : i64, scratch_operands = 0 : i64, tpu.core_type = #tpu.core_type<tc>, window_params = [{transform_indices = @transform_0, window_bounds = array<i64: 16, 128>}, {transform_indices = @transform_1, window_bounds = array<i64: 16, 128>}, {transform_indices = @transform_2, window_bounds = array<i64: 1, 16, 128>}, {transform_indices = @transform_3, window_bounds = array<i64: 1, 16, 128>}, {transform_indices = @transform_4, window_bounds = array<i64: 1, 16, 128>}]} {
    %c0_i32 = arith.constant 0 : i32
    %0 = arith.cmpi eq, %arg2, %c0_i32 : i32
    %1 = arith.extui %0 : i1 to i32
    %c0_i32_0 = arith.constant 0 : i32
    %2 = arith.cmpi ne, %1, %c0_i32_0 : i32
    scf.if %2 {
      %cst_33 = arith.constant 0.000000e+00 : f32
      %69 = vector.broadcast %cst_33 : f32 to vector<16x128xf32>
      %c0_34 = arith.constant 0 : index
      %c0_35 = arith.constant 0 : index
      %c0_36 = arith.constant 0 : index
      %70 = vector.load %arg5[%c0_34, %c0_35, %c0_36] : memref<1x16x128xf32, #tpu.memory_space<vmem>>, vector<1x16x128xf32>
      %71 = vector.shape_cast %70 : vector<1x16x128xf32> to vector<16x128xf32>
      %72 = vector.shape_cast %69 : vector<16x128xf32> to vector<1x16x128xf32>
      tpu.vector_store %arg5[%c0_34, %c0_35, %c0_36], %72 {strides = array<i32>} : memref<1x16x128xf32, #tpu.memory_space<vmem>>, vector<1x16x128xf32>,
      %cst_37 = arith.constant 0.000000e+00 : f32
      %73 = vector.broadcast %cst_37 : f32 to vector<16x128xf32>
      %c0_38 = arith.constant 0 : index
      %c0_39 = arith.constant 0 : index
      %c0_40 = arith.constant 0 : index
      %74 = vector.load %arg6[%c0_38, %c0_39, %c0_40] : memref<1x16x128xf32, #tpu.memory_space<vmem>>, vector<1x16x128xf32>
      %75 = vector.shape_cast %74 : vector<1x16x128xf32> to vector<16x128xf32>
      %76 = vector.shape_cast %73 : vector<16x128xf32> to vector<1x16x128xf32>
      tpu.vector_store %arg6[%c0_38, %c0_39, %c0_40], %76 {strides = array<i32>} : memref<1x16x128xf32, #tpu.memory_space<vmem>>, vector<1x16x128xf32>,
      %cst_41 = arith.constant 0.000000e+00 : f32
      %77 = vector.broadcast %cst_41 : f32 to vector<16x128xf32>
      %c0_42 = arith.constant 0 : index
      %c0_43 = arith.constant 0 : index
      %c0_44 = arith.constant 0 : index
      %78 = vector.load %arg7[%c0_42, %c0_43, %c0_44] : memref<1x16x128xf32, #tpu.memory_space<vmem>>, vector<1x16x128xf32>
      %79 = vector.shape_cast %78 : vector<1x16x128xf32> to vector<16x128xf32>
      %80 = vector.shape_cast %77 : vector<16x128xf32> to vector<1x16x128xf32>
      tpu.vector_store %arg7[%c0_42, %c0_43, %c0_44], %80 {strides = array<i32>} : memref<1x16x128xf32, #tpu.memory_space<vmem>>, vector<1x16x128xf32>,
    } else {
    }
    %c0 = arith.constant 0 : index
    %c0_1 = arith.constant 0 : index
    %3 = vector.load %arg3[%c0, %c0_1] : memref<16x128xf32, #tpu.memory_space<vmem>>, vector<16x128xf32>
    %c0_2 = arith.constant 0 : index
    %c0_3 = arith.constant 0 : index
    %4 = vector.load %arg4[%c0_2, %c0_3] : memref<16x128xbf16, #tpu.memory_space<vmem>>, vector<16x128xbf16>
    %5 = arith.extf %4 : vector<16x128xbf16> to vector<16x128xf32>
    %6 = math.absf %3 : vector<16x128xf32>
    %cst = arith.constant 0.000000e+00 : f32
    %7 = vector.broadcast %cst : f32 to vector<16x128xf32>
    %8 = arith.subf %7, %6 : vector<16x128xf32>
    %9 = math.exp %8 : vector<16x128xf32>
    %10 = math.log1p %9 : vector<16x128xf32>
    %cst_4 = arith.constant 0.000000e+00 : f32
    %11 = vector.broadcast %cst_4 : f32 to vector<16x128xf32>
    %12 = arith.maximumf %3, %11 : vector<16x128xf32>
    %13 = arith.mulf %3, %5 : vector<16x128xf32>
    %14 = arith.subf %12, %13 : vector<16x128xf32>
    %15 = arith.addf %14, %10 : vector<16x128xf32>
    %cst_5 = arith.constant 1.000000e+00 : f32
    %16 = vector.broadcast %cst_5 : f32 to vector<16x128xf32>
    %17 = arith.addf %16, %9 : vector<16x128xf32>
    %cst_6 = arith.constant 1.000000e+00 : f32
    %18 = vector.broadcast %cst_6 : f32 to vector<16x128xf32>
    %19 = arith.divf %18, %17 : vector<16x128xf32>
    %20 = arith.mulf %9, %19 : vector<16x128xf32>
    %cst_7 = arith.constant 0.000000e+00 : f32
    %21 = vector.broadcast %cst_7 : f32 to vector<16x128xf32>
    %22 = arith.cmpf oge, %3, %21 : vector<16x128xf32>
    %23 = arith.select %22, %19, %20 : vector<16x128xi1>, vector<16x128xf32>
    %24 = arith.select %22, %20, %19 : vector<16x128xi1>, vector<16x128xf32>
    %cst_8 = arith.constant 0.000000e+00 : f32
    %25 = vector.broadcast %cst_8 : f32 to vector<16x128xf32>
    %26 = arith.minimumf %3, %25 : vector<16x128xf32>
    %27 = arith.subf %26, %10 : vector<16x128xf32>
    %cst_9 = arith.constant -16.1180954 : f32
    %28 = vector.broadcast %cst_9 : f32 to vector<16x128xf32>
    %29 = arith.maximumf %27, %28 : vector<16x128xf32>
    %cst_10 = arith.constant 0.000000e+00 : f32
    %30 = vector.broadcast %cst_10 : f32 to vector<16x128xf32>
    %31 = arith.subf %30, %12 : vector<16x128xf32>
    %32 = arith.subf %31, %10 : vector<16x128xf32>
    %cst_11 = arith.constant -16.1180954 : f32
    %33 = vector.broadcast %cst_11 : f32 to vector<16x128xf32>
    %34 = arith.maximumf %32, %33 : vector<16x128xf32>
    %35 = arith.mulf %24, %24 : vector<16x128xf32>
    %cst_12 = arith.constant -8.000000e-01 : f32
    %36 = vector.broadcast %cst_12 : f32 to vector<16x128xf32>
    %37 = arith.mulf %36, %35 : vector<16x128xf32>
    %38 = arith.mulf %37, %5 : vector<16x128xf32>
    %39 = arith.mulf %38, %29 : vector<16x128xf32>
    %40 = arith.mulf %23, %23 : vector<16x128xf32>
    %cst_13 = arith.constant 2.000000e-01 : f32
    %41 = vector.broadcast %cst_13 : f32 to vector<16x128xf32>
    %42 = arith.mulf %41, %40 : vector<16x128xf32>
    %cst_14 = arith.constant 1.000000e+00 : f32
    %43 = vector.broadcast %cst_14 : f32 to vector<16x128xf32>
    %44 = arith.subf %43, %5 : vector<16x128xf32>
    %45 = arith.mulf %42, %44 : vector<16x128xf32>
    %46 = arith.mulf %45, %34 : vector<16x128xf32>
    %47 = arith.subf %39, %46 : vector<16x128xf32>
    %48 = arith.addf %15, %47 : vector<16x128xf32>
    %c0_15 = arith.constant 0 : index
    %c0_16 = arith.constant 0 : index
    %c0_17 = arith.constant 0 : index
    %49 = vector.load %arg5[%c0_15, %c0_16, %c0_17] : memref<1x16x128xf32, #tpu.memory_space<vmem>>, vector<1x16x128xf32>
    %50 = vector.shape_cast %49 : vector<1x16x128xf32> to vector<16x128xf32>
    %51 = arith.addf %50, %48 : vector<16x128xf32>
    %c0_18 = arith.constant 0 : index
    %c0_19 = arith.constant 0 : index
    %c0_20 = arith.constant 0 : index
    %52 = vector.load %arg5[%c0_18, %c0_19, %c0_20] : memref<1x16x128xf32, #tpu.memory_space<vmem>>, vector<1x16x128xf32>
    %53 = vector.shape_cast %52 : vector<1x16x128xf32> to vector<16x128xf32>
    %54 = vector.shape_cast %51 : vector<16x128xf32> to vector<1x16x128xf32>
    tpu.vector_store %arg5[%c0_18, %c0_19, %c0_20], %54 {strides = array<i32>} : memref<1x16x128xf32, #tpu.memory_space<vmem>>, vector<1x16x128xf32>,
    %c0_21 = arith.constant 0 : index
    %c0_22 = arith.constant 0 : index
    %c0_23 = arith.constant 0 : index
    %55 = vector.load %arg6[%c0_21, %c0_22, %c0_23] : memref<1x16x128xf32, #tpu.memory_space<vmem>>, vector<1x16x128xf32>
    %56 = vector.shape_cast %55 : vector<1x16x128xf32> to vector<16x128xf32>
    %57 = arith.mulf %23, %5 : vector<16x128xf32>
    %58 = arith.addf %56, %57 : vector<16x128xf32>
    %c0_24 = arith.constant 0 : index
    %c0_25 = arith.constant 0 : index
    %c0_26 = arith.constant 0 : index
    %59 = vector.load %arg6[%c0_24, %c0_25, %c0_26] : memref<1x16x128xf32, #tpu.memory_space<vmem>>, vector<1x16x128xf32>
    %60 = vector.shape_cast %59 : vector<1x16x128xf32> to vector<16x128xf32>
    %61 = vector.shape_cast %58 : vector<16x128xf32> to vector<1x16x128xf32>
    tpu.vector_store %arg6[%c0_24, %c0_25, %c0_26], %61 {strides = array<i32>} : memref<1x16x128xf32, #tpu.memory_space<vmem>>, vector<1x16x128xf32>,
    %c0_27 = arith.constant 0 : index
    %c0_28 = arith.constant 0 : index
    %c0_29 = arith.constant 0 : index
    %62 = vector.load %arg7[%c0_27, %c0_28, %c0_29] : memref<1x16x128xf32, #tpu.memory_space<vmem>>, vector<1x16x128xf32>
    %63 = vector.shape_cast %62 : vector<1x16x128xf32> to vector<16x128xf32>
    %64 = arith.addf %23, %5 : vector<16x128xf32>
    %65 = arith.addf %63, %64 : vector<16x128xf32>
    %c0_30 = arith.constant 0 : index
    %c0_31 = arith.constant 0 : index
    %c0_32 = arith.constant 0 : index
    %66 = vector.load %arg7[%c0_30, %c0_31, %c0_32] : memref<1x16x128xf32, #tpu.memory_space<vmem>>, vector<1x16x128xf32>
    %67 = vector.shape_cast %66 : vector<1x16x128xf32> to vector<16x128xf32>
    %68 = vector.shape_cast %65 : vector<16x128xf32> to vector<1x16x128xf32>
    tpu.vector_store %arg7[%c0_30, %c0_31, %c0_32], %68 {strides = array<i32>} : memref<1x16x128xf32, #tpu.memory_space<vmem>>, vector<1x16x128xf32>,
    return
  }
  func.func @transform_0(%arg0: i32, %arg1: i32, %arg2: i32) -> (i32, i32) {
    %c1_i32 = arith.constant 1 : i32
    %0 = arith.muli %arg1, %c1_i32 : i32
    %1 = arith.addi %0, %arg2 : i32
    %c0_i32 = arith.constant 0 : i32
    return %arg0, %1 : i32, i32
  }
  func.func @transform_1(%arg0: i32, %arg1: i32, %arg2: i32) -> (i32, i32) {
    %c1_i32 = arith.constant 1 : i32
    %0 = arith.muli %arg1, %c1_i32 : i32
    %1 = arith.addi %0, %arg2 : i32
    %c0_i32 = arith.constant 0 : i32
    return %arg0, %1 : i32, i32
  }
  func.func @transform_2(%arg0: i32, %arg1: i32, %arg2: i32) -> (i32, i32, i32) {
    %c0_i32 = arith.constant 0 : i32
    %c0_i32_0 = arith.constant 0 : i32
    return %arg1, %arg0, %c0_i32 : i32, i32, i32
  }
  func.func @transform_3(%arg0: i32, %arg1: i32, %arg2: i32) -> (i32, i32, i32) {
    %c0_i32 = arith.constant 0 : i32
    %c0_i32_0 = arith.constant 0 : i32
    return %arg1, %arg0, %c0_i32 : i32, i32, i32
  }
  func.func @transform_4(%arg0: i32, %arg1: i32, %arg2: i32) -> (i32, i32, i32) {
    %c0_i32 = arith.constant 0 : i32
    %c0_i32_0 = arith.constant 0 : i32
    return %arg1, %arg0, %c0_i32 : i32, i32, i32
  }
}

</mosaic_0001>

<bundles_post_ra>
// kernel: tpu_custom_call.1
= control target key start
LH: loop header
LB: loop body
LE: loop exit
PB: predicated region body
PF: predicated region fallthrough
CT: control target
= control target key end

     0   :  { %s1430_s0 = inlined_call_operand.hbm [shape: f32[16,256], index: 0, kind: input, shape index: {}]   ;;  %s1431_s1 = inlined_call_operand.hbm [shape: bf16[16,256], index: 1, kind: input, shape index: {}]   ;;  %s1432_s2 = inlined_call_operand.hbm [shape: f32[2,16,128], index: 2, kind: output, shape index: {0}]   ;;  %s1433_s3 = inlined_call_operand.hbm [shape: f32[2,16,128], index: 3, kind: output, shape index: {1}]   ;;  %s1434_s4 = inlined_call_operand.hbm [shape: f32[2,16,128], index: 4, kind: output, shape index: {2}]  }
   0x1   :  { %1439 = sst [smem:[#allocation16_spill]] %s1430_s0 }
   0x2   :  { %10 = vsyncpa [#allocation3], 0 }
   0x3   :  { %12 = vsyncpa [#allocation3 + $0x1], 0 }
   0x4   :  { %13 = vsyncpa [#allocation6], 0 }
   0x5   :  { %15 = vsyncpa [#allocation6 + $0x1], 0 }
   0x6   :  { %16 = vsyncpa [#allocation4], 0 }
   0x7   :  { %18 = vsyncpa [#allocation4 + $0x1], 0 }
   0x8   :  { %19 = vsyncpa [#allocation9], 0 }
   0x9   :  { %21 = vsyncpa [#allocation9 + $0x1], 0  ;;  %s1059_s15 = smov 0   ;;  %s1061_s16 = smov 0  }
   0xa   :  { %s1063_s17 = smov 0   ;;  %s1065_s18 = smov 0  }
   0xb   :  { %s1067_s19 = smov 0   ;;  %s1069_s20 = smov 0  }
   0xc LB: > { %s1090_s21 = sadd.s32 4294967295, %s1020_s20   ;;  %s1436_s22 = sadd.s32 4294967294, %s1020_s20   ;;  %s1020_s20 = sphi %s1069_s20, %s27_s20   ;;  %s1016_s19 = sphi %s1067_s19, %s1462_s19   ;;  %s1012_s18 = sphi %s1065_s18, %s1461_s18   ;;  %s1008_s17 = sphi %s1063_s17, %s1460_s17   ;;  %s1004_s16 = sphi %s1061_s16, %s1459_s16   ;;  %s1000_s15 = sphi %s1059_s15, %s1458_s15  }
   0xd   : > { %s42_s23 = sadd.s32 1, %s1016_s19  ;;  %s57_s24 = sadd.s32 1, %s1008_s17 }
   0xe   : > { %p44_p0 = scmp.ge.s32.totalorder %s42_s23, 2  ;;  %p64_p1 = scmp.ne.s32.totalorder %s1008_s17, %s1004_s16 }
   0xf   : > { %p65_p2 = scmp.eq.s32.totalorder %s1020_s20, 0  ;;  %p70_p3 = scmp.ne.s32.totalorder %s1004_s16, %s1000_s15 }
  0x10   : > { %s1464_s23 = smov (%p44_p0, %s42_s23), 0  ;;  %p71_p5 = scmp.eq.s32.totalorder %s1090_s21, 0 }
  0x11   : > { %1440 = sst [smem:[#allocation15_spill]] %s1464_s23  ;;  %p1102_p4 = por %p65_p2, %p64_p1 }
  0x12   : > { %s53_s26 = ssub.s32 %s1016_s19, %s1464_s23  ;;  %p126_p6 = scmp.eq.s32.totalorder %s1090_s21, 1 }
  0x13   : > { %p55_p7 = scmp.eq.s32.totalorder %s53_s26, 0  ;;  %p1110_p8 = por %p71_p5, %p70_p3 }
  0x14   : > { %p1114_p9 = por %p126_p6, %p64_p1  ;;  %p132_p10 = scmp.eq.s32.totalorder %s1436_s22, 1 }
  0x15   : > { %s1442_s27 = scalar_select %p1110_p8, 1, 0 }
  0x16   : > { %s1443_s28 = scalar_select %p1114_p9, 1, 0 }
  0x17   : > { %s1121_s29 = scalar_select %p55_p7, %s1008_s17, %s57_s24  }
  0x18   : > { %p1123_p11 = por %p132_p10, %p70_p3  ;;  %p744_p13 = scmp.lt.s32.totalorder %s1020_s20, 2 }
  0x19   : > { %s1130_s5 = sand.u32 1, %s1008_s17   ;;  %s690_s7 = sshll.u32 %s1016_s19, 7 }
  0x1a   : > { %s1444_s30 = scalar_select %p1123_p11, 1, 0 }
  0x1b   : > { %s689_s6 = sshll.u32 %s1130_s5, 4  ;;  %s1445_s0 = sld [smem:[#allocation16_spill]] }
  0x1c   : > { %s212_s11 = scalar_lea.vmem [#allocation2], %s689_s6  ;;  %p1143_p0 = pnand %p744_p13, %p1102_p4 }
  0x1d   : > { %s222_s12 = sshll.u32 %s212_s11, 4  ;;  %s209_s14 = scalar_lea.sflag [#allocation3], %s1130_s5  ;;  %s1139_s12 = int_to_ptr.vmem [resolvable:$true] %s222_s12 }
  0x1e   : > { %p816_p2 = pneg %p1143_p0 }
  0x21   : > { %s1137_s10 = scalar_lea.hbm %s1445_s0, %s690_s7  ;;  %s819_s7 = scalar_lea.hbm %s1445_s0, 512 }
  0x22   : > { %s814_s24 = scalar_lea.hbm %s1137_s10, 256  ;;  %p820_p4 = scmp.lt.u32.totalorder %s1137_s10, %s1445_s0 }
  0x23   : > { %p815_p1 = scmp.ne.s32.totalorder %s1137_s10, %s814_s24  ;;  %p821_p6 = scmp.lt.u32.totalorder %s819_s7, %s814_s24 }
  0x24   : > { %p823_p10 = scmp.lt.u32.totalorder %s814_s24, %s1137_s10 }
  0x25   : > { %p817_p3 = pnand %p816_p2, %p815_p1  ;;  %p822_p7 = por %p821_p6, %p820_p4 }
  0x27   : > { %p818_p5 = pneg %p817_p3  ;;  %p824_p13 = por %p823_p10, %p822_p7 }
  0x29   : > { %p825_p12 = pnand %p824_p13, %p818_p5 }
  0x2b   : > { %828 = shalt.err (!%p825_p12)
}
  0x2c   : > { %s829_s9 = scalar_lea.vmem %s1139_s12, 256  ;;  %s1022_s11 = smov [#allocation2]  }
  0x2d   : > { %p830_p1 = scmp.ne.s32.totalorder %s1139_s12, %s829_s9  ;;  %s834_s26 = sshll.u32 %s1022_s11, 4  ;;  %s835_s26 = int_to_ptr.vmem [resolvable:$false] %s834_s26 }
  0x2e   : > { %s836_s6 = scalar_lea.vmem %s835_s26, 512  ;;  %p837_p9 = scmp.lt.s32.totalorder %s1139_s12, %s835_s26 }
  0x2f   : > { %p832_p3 = pnand %p830_p1, %p816_p2  ;;  %p838_p4 = scmp.lt.s32.totalorder %s836_s6, %s829_s9 }
  0x31   : > { %p833_p11 = pneg %p832_p3  ;;  %p839_p6 = por %p838_p4, %p837_p9 }
  0x33   : > { %p840_p7 = pnand %p839_p6, %p833_p11 }
  0x35   : > { %843 = shalt.err (!%p840_p7)
}
  0x36   : > { %s1023_s24 = smov 256   ;;  %s1024_s7 = smov 128  }
  0x37   : > { %s1025_s25 = smov 8   ;;  %p693_p9 = scmp.ge.s32.totalorder %s1020_s20, 1 }
  0x38   : > { %730 = dma.hbm_to_vmem [thread:$0]  (!%p1143_p0), %s1137_s10, 256, %s1139_s12, %s209_s14, %s1023_s24, %s1024_s7, %s1025_s25  }
  0x39   : > { %p254_p11 = scmp.lt.s32.totalorder %s1020_s20, 3  ;;  %s691_s8 = sshll.u32 %s1130_s5, 3 }
  0x3a   : > { %s692_s11 = sshll.u32 %s1016_s19, 6  ;;  %s236_s26 = scalar_lea.vmem [#allocation5], %s691_s8 }
  0x3b   : > { %p1179_p12 = pnand %p693_p9, %p254_p11  ;;  %s246_s6 = sshll.u32 %s236_s26, 4  ;;  %s1189_s6 = int_to_ptr.vmem [resolvable:$true] %s246_s6 }
  0x3c   : > { %s1187_s23 = scalar_lea.hbm %s1431_s1, %s692_s11  ;;  %s233_s10 = scalar_lea.sflag [#allocation6], %s1130_s5 }
  0x3d   : > { %s844_s12 = scalar_lea.hbm %s1187_s23, 128  ;;  %s849_s25 = scalar_lea.hbm %s1431_s1, 256 }
  0x3e   : > { %p845_p5 = scmp.ne.s32.totalorder %s1187_s23, %s844_s12  ;;  %p850_p1 = scmp.lt.u32.totalorder %s1187_s23, %s1431_s1 }
  0x3f   : > { %p851_p3 = scmp.lt.u32.totalorder %s849_s25, %s844_s12  ;;  %p853_p6 = scmp.lt.u32.totalorder %s844_s12, %s1187_s23 }
  0x40   : > { %p847_p10 = pnand %p845_p5, %p816_p2 }
  0x41   : > { %p852_p4 = por %p851_p3, %p850_p1 }
  0x42   : > { %p848_p13 = pneg %p847_p10 }
  0x43   : > { %p854_p7 = por %p853_p6, %p852_p4 }
  0x45   : > { %p855_p9 = pnand %p854_p7, %p848_p13 }
  0x47   : > { %858 = shalt.err (!%p855_p9)
}
  0x48   : > { %s859_s8 = scalar_lea.vmem %s1189_s6, 128  ;;  %s1026_s11 = smov [#allocation5]  }
  0x49   : > { %p860_p11 = scmp.ne.s32.totalorder %s1189_s6, %s859_s8  ;;  %s864_s26 = sshll.u32 %s1026_s11, 4  ;;  %s865_s26 = int_to_ptr.vmem [resolvable:$false] %s864_s26 }
  0x4a   : > { %s866_s14 = scalar_lea.vmem %s865_s26, 256  ;;  %p867_p8 = scmp.lt.s32.totalorder %s1189_s6, %s865_s26 }
  0x4b   : > { %p862_p5 = pnand %p860_p11, %p816_p2  ;;  %p868_p1 = scmp.lt.s32.totalorder %s866_s14, %s859_s8 }
  0x4d   : > { %p863_p10 = pneg %p862_p5  ;;  %p869_p3 = por %p868_p1, %p867_p8 }
  0x4f   : > { %p870_p4 = pnand %p869_p3, %p863_p10 }
  0x51   : > { %873 = shalt.err (!%p870_p4)
}
  0x52   : > { %s1027_s12 = smov 64   ;;  %s1028_s24 = smov 4  }
  0x53   : > { %733 = dma.hbm_to_vmem [thread:$0]  (!%p1143_p0), %s1187_s23, 128, %s1189_s6, %s233_s10, %s1024_s7, %s1027_s12, %s1028_s24  }
  0x54   : > { %258 = sbr.rel (%p1179_p12) target bundleno = 196 (0xc4), region = 28  ;;  %s1221_s25 = sand.u32 (!%p1179_p12), 1, %s1004_s16  }
  0x55   : > { %s1224_s0 = sshll.u32 (!%p1179_p12), %s1221_s25, 4  ;;  %s261_s22 = scalar_lea.sflag (!%p1179_p12), [#allocation3], %s1221_s25 }
  0x56   : > { %s264_s8 = scalar_lea.vmem (!%p1179_p12), [#allocation2], %s1224_s0  ;;  %p1448_p8 = scmp.ne.s32.totalorder (!%p1179_p12), %s1442_s27, 0 }
  0x5b   : > { %983 = dma.done.wait (%p1448_p8), %s261_s22, 256  }
  0x5c   : > { %985 = vsyncadd (%p1448_p8), %s261_s22, 4294967040  ;;  %s695_s23 = sshll.u32 %s1221_s25, 3  ;;  %s270_s5 = scalar_lea.sflag [#allocation6], %s1221_s25 }
  0x5d   : > { %s273_s13 = scalar_lea.vmem [#allocation5], %s695_s23 }
  0x5e   : > { %987 = dma.done.wait (%p1448_p8), %s270_s5, 128  }
  0x5f   : > { %989 = vsyncadd (%p1448_p8), %s270_s5, 4294967168  ;;  %v1238_v0 = vld [vmem:[%s264_s8] sm:$0xff]  ;;  %v1240_v1 = vld [vmem:[%s264_s8 + $0x8] sm:$0xff]  ;;  %s445_s27 = sand.u32 1, %s1090_s21   ;;  %s1274_s7 = sshll.u32 %s1012_s18, 8 }
  0x60   : > { %v336_v2 = vand.u32 2147483647, %v1238_v0  ;;  %v337_v3 = vand.u32 2147483647, %v1240_v1  ;;  %v714_v12 = vld [vmem:[%s273_s13] sm:$0xff]   ;;  %v362_v15 = vmax.f32 %v1238_v0, 0.0  ;;  %s1286_s11 = scalar_lea.hbm %s1433_s3, %s1274_s7 }
  0x61   : > { %v715_v14 = vunpack.c.l.bf16 %v714_v12  ;;  %v363_v18 = vmax.f32 %v1240_v1, 0.0  ;;  %v1247_v19 = vunpack.c.h.bf16 %v714_v12  ;;  %vm378_vm0 = vcmp.ge.f32.partialorder %v1238_v0, 0.0  ;;  %s305_s9 = scalar_lea.vmem [#allocation8], %s1224_s0  ;;  %s1291_s26 = scalar_lea.vmem [#allocation10], %s1224_s0 }
  0x62   : > { %v338_v4 = vsub.f32 0.0, %v336_v2  ;;  %v339_v5 = vsub.f32 0.0, %v337_v3  ;;  %vm379_vm1 = vcmp.ge.f32.partialorder %v1240_v1, 0.0  ;;  %v384_v22 = vmin.f32 %v1238_v0, 0.0  ;;  %s484_s6 = sshll.u32 %s305_s9, 4  ;;  %s502_s14 = sshll.u32 %s1291_s26, 4  ;;  %s1288_s6 = int_to_ptr.vmem [resolvable:$true] %s484_s6  ;;  %s1341_s14 = int_to_ptr.vmem [resolvable:$true] %s502_s14 }
  0x63   : > { %v364_v17 = vmul.f32 %v715_v14, %v1238_v0  ;;  %v390_v25 = vsub.f32 0.0, %v362_v15  ;;  %v408_v26 = vsub.f32 1.0, %v715_v14  ;;  %v365_v27 = vmul.f32 %v1247_v19, %v1240_v1  ;;  %s1297_s12 = scalar_lea.sflag [#allocation9], %s445_s27  ;;  %s874_s24 = scalar_lea.vmem %s1288_s6, 256 }
  0x64   : > { %v340_v6 = vmul.f32 1.442695, %v338_v4  ;;  %v342_v7 = vmul.f32 1.442695, %v339_v5  ;;  %v385_v28 = vmin.f32 %v1240_v1, 0.0  ;;  %v1255_v33 = vsub.f32 0.0, %v363_v18  ;;  %p875_p0 = scmp.ne.s32.totalorder %s1288_s6, %s874_s24 }
  0x65   : > { %v366_v32 = vsub.f32 %v362_v15, %v364_v17  ;;  %v409_v38 = vsub.f32 1.0, %v1247_v19  ;;  %v367_v4 = vsub.f32 %v363_v18, %v365_v27  ;;  %p1453_p2 = scmp.ne.s32.totalorder %s1443_s28, 0  ;;  %s1029_s22 = smov [#allocation8]  }
  0x66   : > { %802 = vpow2.f32 %v340_v6  ;;  %s878_s8 = sshll.u32 %s1029_s22, 4  ;;  %s879_s8 = int_to_ptr.vmem [resolvable:$false] %s878_s8 }
  0x67   : > { %804 = vpow2.f32 %v342_v7  ;;  %p876_p12 = pnand %p875_p0, %p1453_p2  ;;  %s880_s23 = scalar_lea.vmem %s879_s8, 512 }
  0x68   : > { %p881_p6 = scmp.lt.s32.totalorder %s1288_s6, %s879_s8  ;;  %p882_p7 = scmp.lt.s32.totalorder %s880_s23, %s874_s24 }
  0x69   : > { %p877_p13 = pneg %p876_p12 }
  0x6a   : > { %p883_p9 = por %p882_p7, %p881_p6 }
  0x6c   : > { %p884_p11 = pnand %p883_p9, %p877_p13 }
  0x70   : > { %v803_v8 = vpop.eup %802 }
  0x71   : > { %v805_v9 = vpop.eup %804  ;;  %v344_v10 = vadd.f32 1.0, %v803_v8  ;;  %v347_v13 = vmul.f32 -0.5, %v803_v8  ;;  %v350_v20 = vand.u32 2147483647, %v803_v8 }
  0x72   : > { %v353_v11 = vadd.f32 1.0, %v805_v9  ;;  %v356_v21 = vmul.f32 -0.5, %v805_v9  ;;  %v359_v23 = vand.u32 2147483647, %v805_v9 }
  0x73   : > { %806 = vrcp.f32 %v344_v10  ;;  %v348_v16 = vadd.f32 1.0, %v347_v13  ;;  %vm1257_vm2 = vcmp.lt.f32.partialorder %v350_v20, 0.0004427343 }
  0x74   : > { %808 = vrcp.f32 %v353_v11  ;;  %v357_v37 = vadd.f32 1.0, %v356_v21  ;;  %vm1267_vm3 = vcmp.lt.f32.partialorder %v359_v23, 0.0004427343 }
  0x75   : > { %810 = vlog2.f32 %v344_v10  ;;  %v349_v31 = vmul.f32 %v803_v8, %v348_v16 }
  0x76   : > { %812 = vlog2.f32 %v353_v11  ;;  %v358_v57 = vmul.f32 %v805_v9, %v357_v37 }
  0x7d   : > { %v807_v24 = vpop.eup %806 }
  0x7e   : > { %v809_v29 = vpop.eup %808  ;;  %v376_v30 = vmul.f32 %v807_v24, %v803_v8 }
  0x7f   : > { %v811_v34 = vpop.eup %810  ;;  %v377_v35 = vmul.f32 %v809_v29, %v805_v9 }
  0x80   : > { %v380_v39 = vsel %vm378_vm0, %v807_v24, %v376_v30  ;;  %v382_v40 = vsel %vm378_vm0, %v376_v30, %v807_v24  ;;  %v346_v41 = vmul.f32 0.6931472, %v811_v34  ;;  %v813_v51 = vpop.eup %812 }
  0x81   : > { %v396_v43 = vmul.f32 %v382_v40, %v382_v40  ;;  %v404_v44 = vmul.f32 %v380_v39, %v380_v39  ;;  %v426_v45 = vmul.f32 %v715_v14, %v380_v39  ;;  %v381_v46 = vsel %vm379_vm1, %v809_v29, %v377_v35 }
  0x82   : > { %v383_v47 = vsel %vm379_vm1, %v377_v35, %v809_v29  ;;  %v405_v48 = vmul.f32 %v381_v46, %v381_v46  ;;  %v427_v49 = vmul.f32 %v1247_v19, %v381_v46  ;;  %v352_v50 = vsel %vm1257_vm2, %v349_v31, %v346_v41 }
  0x83   : > { %v398_v52 = vmul.f32 -0.8, %v396_v43  ;;  %v406_v53 = vmul.f32 0.2, %v404_v44  ;;  %v397_v54 = vmul.f32 %v383_v47, %v383_v47  ;;  %v386_v56 = vsub.f32 %v384_v22, %v352_v50  ;;  %430 = vst [vmem:[%s305_s9] sm:$0xff] %v426_v45 }
  0x84   : > { %v407_v55 = vmul.f32 0.2, %v405_v48  ;;  %v392_v59 = vsub.f32 %v390_v25, %v352_v50  ;;  %431 = vst [vmem:[%s305_s9 + $0x8] sm:$0xff] %v427_v49  ;;  %v355_v63 = vmul.f32 0.6931472, %v813_v51  ;;  %v434_v0 = vadd.f32 %v715_v14, %v380_v39 }
  0x85   : > { %v399_v58 = vmul.f32 -0.8, %v397_v54  ;;  %v400_v60 = vmul.f32 %v715_v14, %v398_v52  ;;  %v410_v61 = vmul.f32 %v408_v26, %v406_v53  ;;  %v388_v62 = vmax.f32 %v386_v56, -16.118095 }
  0x86   : > { %v368_v2 = vadd.f32 %v366_v32, %v352_v50  ;;  %v394_v3 = vmax.f32 %v392_v59, -16.118095  ;;  %v435_v5 = vadd.f32 %v1247_v19, %v381_v46 }
  0x87   : > { %887 = shalt.err (!%p884_p11)
}
  0x88   : > { %s888_s21 = scalar_lea.hbm %s1286_s11, 256  ;;  %s892_s27 = scalar_lea.hbm %s1433_s3, 512 }
  0x89   : > { %p889_p5 = scmp.ne.s32.totalorder %s1286_s11, %s888_s21  ;;  %p893_p3 = scmp.lt.u32.totalorder %s1286_s11, %s1433_s3 }
  0x8a   : > { %p894_p4 = scmp.lt.u32.totalorder %s892_s27, %s888_s21  ;;  %p896_p0 = scmp.lt.u32.totalorder %s888_s21, %s1286_s11 }
  0x8b   : > { %p890_p10 = pnand %p889_p5, %p1453_p2 }
  0x8c   : > { %p895_p8 = por %p894_p4, %p893_p3 }
  0x8d   : > { %p891_p1 = pneg %p890_p10 }
  0x8e   : > { %p897_p12 = por %p896_p0, %p895_p8 }
  0x90   : > { %p898_p13 = pnand %p897_p12, %p891_p1 }
  0x92   : > { %901 = shalt.err (!%p898_p13)
}
  0x93   : > { %s1030_s10 = smov 128   ;;  %s1031_s24 = smov 8   ;;  %v402_v6 = vmul.f32 %v400_v60, %v388_v62  ;;  %v361_v7 = vsel %vm1267_vm3, %v358_v57, %v355_v63  ;;  %v411_v8 = vmul.f32 %v409_v38, %v407_v55  ;;  %v412_v9 = vmul.f32 %v410_v61, %v394_v3  ;;  %438 = vst [vmem:[%s1291_s26] sm:$0xff] %v434_v0 }
  0x94   : > { %722 = dma.vmem_to_hbm [thread:$0]  (%p1453_p2), %s1288_s6, 256, %s1286_s11, %s1297_s12, %s1030_s10, %s1030_s10, %s1031_s24   ;;  %v387_v10 = vsub.f32 %v385_v28, %v361_v7  ;;  %v393_v11 = vsub.f32 %v1255_v33, %v361_v7  ;;  %v401_v12 = vmul.f32 %v1247_v19, %v399_v58  ;;  %v369_v16 = vadd.f32 %v367_v4, %v361_v7 }
  0x95   : > { %s1337_s6 = scalar_lea.hbm %s1434_s4, %s1274_s7  ;;  %v414_v13 = vsub.f32 %v402_v6, %v412_v9  ;;  %439 = vst [vmem:[%s1291_s26 + $0x8] sm:$0xff] %v435_v5  ;;  %s902_s11 = scalar_lea.vmem %s1341_s14, 256 }
  0x96   : > { %v389_v1 = vmax.f32 %v387_v10, -16.118095  ;;  %v395_v14 = vmax.f32 %v393_v11, -16.118095  ;;  %p903_p6 = scmp.ne.s32.totalorder %s1341_s14, %s902_s11  ;;  %s1032_s23 = smov [#allocation10]  }
  0x97   : > { %v416_v15 = vadd.f32 %v414_v13, %v368_v2  ;;  %s906_s21 = sshll.u32 %s1032_s23, 4  ;;  %s907_s21 = int_to_ptr.vmem [resolvable:$false] %s906_s21 }
  0x98   : > { %v403_v17 = vmul.f32 %v401_v12, %v389_v1  ;;  %v413_v18 = vmul.f32 %v411_v8, %v395_v14  ;;  %p904_p7 = pnand %p903_p6, %p1453_p2  ;;  %s908_s5 = scalar_lea.vmem %s907_s21, 512 }
  0x99   : > { %p909_p11 = scmp.lt.s32.totalorder %s1341_s14, %s907_s21  ;;  %p910_p5 = scmp.lt.s32.totalorder %s908_s5, %s902_s11 }
  0x9a   : > { %p905_p9 = pneg %p904_p7 }
  0x9b   : > { %p911_p10 = por %p910_p5, %p909_p11 }
  0x9d   : > { %p912_p1 = pnand %p911_p10, %p905_p9 }
  0x9f   : > { %915 = shalt.err (!%p912_p1)
}
  0xa0   : > { %s916_s26 = scalar_lea.hbm %s1337_s6, 256  ;;  %s920_s9 = scalar_lea.hbm %s1434_s4, 512 }
  0xa1   : > { %p917_p3 = scmp.ne.s32.totalorder %s1337_s6, %s916_s26  ;;  %p921_p0 = scmp.lt.u32.totalorder %s1337_s6, %s1434_s4 }
  0xa2   : > { %p922_p12 = scmp.lt.u32.totalorder %s920_s9, %s916_s26  ;;  %p924_p6 = scmp.lt.u32.totalorder %s916_s26, %s1337_s6 }
  0xa3   : > { %p918_p4 = pnand %p917_p3, %p1453_p2 }
  0xa4   : > { %p923_p13 = por %p922_p12, %p921_p0 }
  0xa5   : > { %p919_p8 = pneg %p918_p4 }
  0xa6   : > { %p925_p7 = por %p924_p6, %p923_p13 }
  0xa8   : > { %p926_p9 = pnand %p925_p7, %p919_p8 }
  0xaa   : > { %929 = shalt.err (!%p926_p9)
}
  0xab   : > { %723 = dma.vmem_to_hbm [thread:$0]  (%p1453_p2), %s1341_s14, 256, %s1337_s6, %s1297_s12, %s1030_s10, %s1030_s10, %s1031_s24   ;;  %v415_v19 = vsub.f32 %v403_v17, %v413_v18 }
  0xac   : > { %s298_s8 = scalar_lea.vmem [#allocation7], %s1224_s0  ;;  %s1374_s5 = scalar_lea.hbm %s1432_s2, %s1274_s7 }
  0xad   : > { %s466_s11 = sshll.u32 %s298_s8, 4  ;;  %422 = vst [vmem:[%s298_s8] sm:$0xff] %v416_v15  ;;  %v417_v20 = vadd.f32 %v415_v19, %v369_v16  ;;  %s441_s26 = scalar_lea.sflag [#allocation4], %s1221_s25  ;;  %s1376_s11 = int_to_ptr.vmem [resolvable:$true] %s466_s11 }
  0xae   : > { %s930_s13 = scalar_lea.vmem %s1376_s11, 256  ;;  %s1033_s0 = smov [#allocation7]  }
  0xaf   : > { %423 = vst [vmem:[%s298_s8 + $0x8] sm:$0xff] %v417_v20  ;;  %p931_p11 = scmp.ne.s32.totalorder %s1376_s11, %s930_s13  ;;  %s934_s14 = sshll.u32 %s1033_s0, 4  ;;  %s935_s14 = int_to_ptr.vmem [resolvable:$false] %s934_s14 }
  0xb0   : > { %s936_s12 = scalar_lea.vmem %s935_s14, 512  ;;  %p937_p1 = scmp.lt.s32.totalorder %s1376_s11, %s935_s14 }
  0xb1   : > { %p932_p5 = pnand %p931_p11, %p1453_p2  ;;  %p938_p3 = scmp.lt.s32.totalorder %s936_s12, %s930_s13 }
  0xb3   : > { %p933_p10 = pneg %p932_p5  ;;  %p939_p4 = por %p938_p3, %p937_p1 }
  0xb5   : > { %p940_p8 = pnand %p939_p4, %p933_p10 }
  0xb7   : > { %943 = shalt.err (!%p940_p8)
}
  0xb8   : > { %s944_s7 = scalar_lea.hbm %s1374_s5, 256  ;;  %s948_s9 = scalar_lea.hbm %s1432_s2, 512 }
  0xb9   : > { %p945_p0 = scmp.ne.s32.totalorder %s1374_s5, %s944_s7  ;;  %p949_p6 = scmp.lt.u32.totalorder %s1374_s5, %s1432_s2 }
  0xba   : > { %p950_p7 = scmp.lt.u32.totalorder %s948_s9, %s944_s7  ;;  %p952_p11 = scmp.lt.u32.totalorder %s944_s7, %s1374_s5 }
  0xbb   : > { %p946_p12 = pnand %p945_p0, %p1453_p2 }
  0xbc   : > { %p951_p9 = por %p950_p7, %p949_p6 }
  0xbd   : > { %p947_p13 = pneg %p946_p12 }
  0xbe   : > { %p953_p5 = por %p952_p11, %p951_p9 }
  0xc0   : > { %p954_p10 = pnand %p953_p5, %p947_p13 }
  0xc2   : > { %957 = shalt.err (!%p954_p10)
}
  0xc3   : > { %721 = dma.vmem_to_hbm [thread:$0]  (%p1453_p2), %s1376_s11, 256, %s1374_s5, %s441_s26, %s1030_s10, %s1030_s10, %s1031_s24  }
  0xc4 PF: > { %s517_s8 = sand.u32 1, %s1000_s15   ;;  %p1454_p1 = scmp.ne.s32.totalorder %s1444_s30, 0 }
  0xc5   : > { %p1455_p3 = scmp.ge.s32.totalorder %s1020_s20, 2  ;;  %s518_s23 = scalar_lea.sflag [#allocation4], %s517_s8 }
  0xc7   : > { %p735_p4 = pnand %p1455_p3, %p1454_p1 }
  0xc9   : > { %991 = dma.done.wait (!%p735_p4), %s518_s23, 256  }
  0xca   : > { %993 = vsyncadd (!%p735_p4), %s518_s23, 4294967040  ;;  %s1456_s28 = sadd.s32 4294967294, %s1020_s20  }
  0xcb   : > { %s526_s21 = sand.u32 1, %s1456_s28  }
  0xcc   : > { %s527_s13 = scalar_lea.sflag [#allocation9], %s526_s21 }
  0xcd   : > { %995 = dma.done.wait (!%p735_p4), %s527_s13, 512  }
  0xce   : > { %997 = vsyncadd (!%p735_p4), %s527_s13, 4294966784  ;;  %s27_s20 = sadd.s32 1, %s1020_s20   ;;  %s1457_s25 = sld [smem:[#allocation15_spill]] }
  0xcf   : > { %p24_p2 = scmp.ge.s32.totalorder %s27_s20, 4   ;;  %s1458_s15 = smov %s1004_s16 }
  0xd0   : > { %s1459_s16 = smov %s1008_s17  ;;  %s1460_s17 = smov %s1121_s29 }
  0xd1   : > { %s1461_s18 = smov %s1016_s19  ;;  %26 = sbr.rel (!%p24_p2) target bundleno = 12 (0xc), region = 122 }
  0xd4   : > { %s1462_s19 = smov %s1457_s25 }
  0xd8   :  { %541 = vsyncpa [#allocation3], 1 }
  0xd9   :  { %543 = vsyncpa [#allocation3 + $0x1], 1 }
  0xda   :  { %544 = vsyncpa [#allocation6], 1 }
  0xdb   :  { %546 = vsyncpa [#allocation6 + $0x1], 1 }
  0xdc   :  { %547 = vsyncpa [#allocation4], 1 }
  0xdd   :  { %549 = vsyncpa [#allocation4 + $0x1], 1 }
  0xde   :  { %550 = vsyncpa [#allocation9], 1 }
  0xdf   :  { %552 = vsyncpa [#allocation9 + $0x1], 1 }

</bundles_post_ra>
